<compile_context>
chip_gen: v5e
topology: v5e:2x2
jax: 0.10.0
libtpu: 0.0.40
codegen_flags: <defaults>
</compile_context>

<pallas_src>
import jax
import jax.numpy as jnp
from jax.experimental import pallas as pl
from jax.experimental.pallas import tpu as pltpu


def _add_sub_kernel(x_ref, h_ref, add_ref, sub_ref):
    x = x_ref[...]
    h = h_ref[...]
    add_ref[...] = x + h      # accum
    sub_ref[...] = x - h      # sub_accum


def _round_up(a, b):
    return ((a + b - 1) // b) * b


_TARGET_TILE_BYTES = 512 * 1024   # ~0.5 MiB per live buffer (0.25-1 MiB sweet spot)
_MIN_STEPS = 8                    # >= 4 grid steps per TensorCore on v7x
_BIG_BYTES = 1 << 20              # "non-tiny" threshold per array
_SMALL_RAGGED_BYTES = 128 * 1024  # ragged inputs up to this run un-padded as (1, n)


def _run_add_sub(x2, h2, tile_shape, grid_n):
    spec = pl.BlockSpec(tile_shape, lambda i: (i, 0))
    out_shape = (
        jax.ShapeDtypeStruct(x2.shape, x2.dtype),
        jax.ShapeDtypeStruct(x2.shape, x2.dtype),
    )
    return pl.pallas_call(
        _add_sub_kernel,
        grid=(grid_n,),
        in_specs=[spec, spec],
        out_specs=(spec, spec),
        out_shape=out_shape,
        compiler_params=pltpu.CompilerParams(
            dimension_semantics=("parallel",),
        ),
    )(x2, h2)


def my_module_forward(x, h):
    """MyModule.forward: returns (accum, sub_accum) = (x + h, x - h)."""
    assert x.shape == h.shape and x.dtype == h.dtype
    orig_shape = x.shape
    itemsize = jnp.dtype(x.dtype).itemsize
    # Minimum sublane granularity: 8 rows (32-bit), 16 (bf16), 32 (int8).
    min_rows = 8 * max(1, 4 // itemsize)
    n = x.size

    # Pick the widest lane-dense layout the flat size divides evenly.
    width = None
    for w in (1024, 512, 256, 128):
        if n % w == 0:
            width = w
            break

    ragged_pad = False
    if width is None:
        # Ragged size (not a multiple of 128).
        if n * itemsize <= _SMALL_RAGGED_BYTES:
            # Zero-copy reshape to (1, n); one full-array block avoids the
            # extra HBM pad/slice passes entirely (masked stores are fine).
            x2 = x.reshape(1, n)
            h2 = h.reshape(1, n)
            add_p, sub_p = _run_add_sub(x2, h2, (1, n), 1)
            return add_p.reshape(orig_shape), sub_p.reshape(orig_shape)
        # TODO(synk): large ragged inputs could split into an aligned prefix
        # (kernel) + <128-element tail (plain jnp) to avoid the pad/slice
        # HBM passes below.
        width = 128
        padded_n = _round_up(n, width)
        x2 = jnp.pad(x.reshape(-1), (0, padded_n - n)).reshape(-1, width)
        h2 = jnp.pad(h.reshape(-1), (0, padded_n - n)).reshape(-1, width)
        ragged_pad = True
    else:
        x2 = x.reshape(-1, width)
        h2 = h.reshape(-1, width)

    rows = x2.shape[0]
    row_bytes = width * itemsize
    total_bytes = rows * row_bytes

    # Tile sizing: ~0.5 MiB lane-dense blocks; bigger tiles buy <2% roofline
    # but collapse the grid and kill DMA/compute/writeback pipelining.
    tile_rows = max(min_rows,
                    (_TARGET_TILE_BYTES // row_bytes) // min_rows * min_rows)

    # Guarantee several grid steps on non-tiny inputs so both v7x TensorCores
    # get work and input/output DMAs overlap with compute.
    if total_bytes >= _BIG_BYTES and rows >= _MIN_STEPS * min_rows:
        cand = max(min_rows, (rows // _MIN_STEPS) // min_rows * min_rows)
        tile_rows = min(tile_rows, cand)

    if tile_rows >= rows:
        # Tiny input: single full-array block, no per-step overhead.
        tile_rows = rows
        grid_n = 1
    else:
        grid_n = pl.cdiv(rows, tile_rows)
        # Prefer an even number of grid steps (2-TensorCore load balance).
        if grid_n >= 3 and grid_n % 2 == 1 and total_bytes >= _BIG_BYTES:
            cand = _round_up(pl.cdiv(rows, grid_n + 1), min_rows)
            if min_rows <= cand < rows and pl.cdiv(rows, cand) % 2 == 0:
                tile_rows = cand
                grid_n = pl.cdiv(rows, tile_rows)

    add_p, sub_p = _run_add_sub(x2, h2, (tile_rows, width), grid_n)

    def _post(a):
        a = a.reshape(-1)
        if ragged_pad:
            a = a[:n]
        return a.reshape(orig_shape)

    return _post(add_p), _post(sub_p)


if __name__ == "__main__":
    key = jax.random.PRNGKey(0)
    kx, kh, kx2, kh2, kx3, kh3 = jax.random.split(key, 6)

    # Small lane-aligned input (widened to 1024 lanes, single-block path).
    x = jax.random.normal(kx, (16, 128), dtype=jnp.float32)
    h = jax.random.normal(kh, (16, 128), dtype=jnp.float32)
    acc, sub = my_module_forward(x, h)
    jax.block_until_ready((acc, sub))
    assert acc.shape == x.shape and sub.shape == x.shape
    assert jnp.allclose(acc, x + h), "accum mismatch"
    assert jnp.allclose(sub, x - h), "sub_accum mismatch"

    # Ragged / non-128-aligned shape: un-padded (1, n) full-block path.
    x2 = jax.random.normal(kx2, (4, 7, 5), dtype=jnp.float32)
    h2 = jax.random.normal(kh2, (4, 7, 5), dtype=jnp.float32)
    acc2, sub2 = my_module_forward(x2, h2)
    jax.block_until_ready((acc2, sub2))
    assert acc2.shape == x2.shape and sub2.shape == x2.shape
    assert jnp.allclose(acc2, x2 + h2), "accum mismatch (ragged)"
    assert jnp.allclose(sub2, x2 - h2), "sub_accum mismatch (ragged)"

    # Moderate size exercising the multi-step grid with a partial last block.
    x3 = jax.random.normal(kx3, (1111, 256), dtype=jnp.float32)
    h3 = jax.random.normal(kh3, (1111, 256), dtype=jnp.float32)
    acc3, sub3 = my_module_forward(x3, h3)
    jax.block_until_ready((acc3, sub3))
    assert jnp.allclose(acc3, x3 + h3), "accum mismatch (partial block)"
    assert jnp.allclose(sub3, x3 - h3), "sub_accum mismatch (partial block)"

    print("KERNEL_OK")
</pallas_src>

<mosaic_0001>
module attributes {stable_mosaic.version = 11 : i64} {
  func.func @_add_sub_kernel(%arg0: i32, %arg1: memref<2x1024xf32, #tpu.memory_space<vmem>>, %arg2: memref<2x1024xf32, #tpu.memory_space<vmem>>, %arg3: memref<2x1024xf32, #tpu.memory_space<vmem>>, %arg4: memref<2x1024xf32, #tpu.memory_space<vmem>>) attributes {dimension_semantics = [#tpu.dimension_semantics<parallel>], iteration_bounds = array<i64: 1>, scalar_prefetch = 0 : i64, scratch_operands = 0 : i64, tpu.core_type = #tpu.core_type<tc>, window_params = [{transform_indices = @transform_0, window_bounds = array<i64: 2, 1024>}, {transform_indices = @transform_1, window_bounds = array<i64: 2, 1024>}, {transform_indices = @transform_2, window_bounds = array<i64: 2, 1024>}, {transform_indices = @transform_3, window_bounds = array<i64: 2, 1024>}]} {
    %c0 = arith.constant 0 : index
    %c0_0 = arith.constant 0 : index
    %0 = vector.load %arg1[%c0, %c0_0] : memref<2x1024xf32, #tpu.memory_space<vmem>>, vector<2x1024xf32>
    %c0_1 = arith.constant 0 : index
    %c0_2 = arith.constant 0 : index
    %1 = vector.load %arg2[%c0_1, %c0_2] : memref<2x1024xf32, #tpu.memory_space<vmem>>, vector<2x1024xf32>
    %2 = arith.addf %0, %1 : vector<2x1024xf32>
    %c0_3 = arith.constant 0 : index
    %c0_4 = arith.constant 0 : index
    %3 = vector.load %arg3[%c0_3, %c0_4] : memref<2x1024xf32, #tpu.memory_space<vmem>>, vector<2x1024xf32>
    tpu.vector_store %arg3[%c0_3, %c0_4], %2 {strides = array<i32>} : memref<2x1024xf32, #tpu.memory_space<vmem>>, vector<2x1024xf32>,
    %4 = arith.subf %0, %1 : vector<2x1024xf32>
    %c0_5 = arith.constant 0 : index
    %c0_6 = arith.constant 0 : index
    %5 = vector.load %arg4[%c0_5, %c0_6] : memref<2x1024xf32, #tpu.memory_space<vmem>>, vector<2x1024xf32>
    tpu.vector_store %arg4[%c0_5, %c0_6], %4 {strides = array<i32>} : memref<2x1024xf32, #tpu.memory_space<vmem>>, vector<2x1024xf32>,
    return
  }
  func.func @transform_0(%arg0: i32) -> (i32, i32) {
    %c0_i32 = arith.constant 0 : i32
    %c0_i32_0 = arith.constant 0 : i32
    return %arg0, %c0_i32 : i32, i32
  }
  func.func @transform_1(%arg0: i32) -> (i32, i32) {
    %c0_i32 = arith.constant 0 : i32
    %c0_i32_0 = arith.constant 0 : i32
    return %arg0, %c0_i32 : i32, i32
  }
  func.func @transform_2(%arg0: i32) -> (i32, i32) {
    %c0_i32 = arith.constant 0 : i32
    %c0_i32_0 = arith.constant 0 : i32
    return %arg0, %c0_i32 : i32, i32
  }
  func.func @transform_3(%arg0: i32) -> (i32, i32) {
    %c0_i32 = arith.constant 0 : i32
    %c0_i32_0 = arith.constant 0 : i32
    return %arg0, %c0_i32 : i32, i32
  }
}

</mosaic_0001>

<bundles_post_ra>
// kernel: tpu_custom_call.1
= control target key start
LH: loop header
LB: loop body
LE: loop exit
PB: predicated region body
PF: predicated region fallthrough
CT: control target
= control target key end

     0   :  { %9 = vsyncpa [#allocation3], 0  ;;  %s233_s0 = inlined_call_operand.hbm [shape: f32[2,1024], index: 0, kind: input, shape index: {}]   ;;  %s234_s1 = inlined_call_operand.hbm [shape: f32[2,1024], index: 1, kind: input, shape index: {}]   ;;  %s235_s2 = inlined_call_operand.hbm [shape: f32[2,1024], index: 2, kind: output, shape index: {0}]   ;;  %s236_s3 = inlined_call_operand.hbm [shape: f32[2,1024], index: 3, kind: output, shape index: {1}]  }
   0x1   :  { %10 = vsyncpa [#allocation6], 0 }
   0x2   :  { %11 = vsyncpa [#allocation4], 0 }
   0x3   :  { %12 = vsyncpa [#allocation9], 0  ;;  %s18_s14 = sshll.u32 %s233_s0, 4  ;;  %s197_s15 = smov [#allocation2]   ;;  %s19_s14 = int_to_ptr.hbm [resolvable:$true] %s18_s14 }
   0x4   :  { %s20_s16 = sshll.u32 %s197_s15, 4  ;;  %s29_s19 = sshll.u32 %s234_s1, 4  ;;  %s21_s16 = int_to_ptr.vmem [resolvable:$true] %s20_s16  ;;  %s30_s19 = int_to_ptr.hbm [resolvable:$true] %s29_s19 }
   0x5   :  { %23 = dma.hbm_to_vmem [thread:$0]  %s19_s14, 256, %s21_s16, [#allocation3]  }
   0x6   :  { %s198_s20 = smov [#allocation5]  }
   0x7   :  { %s31_s21 = sshll.u32 %s198_s20, 4  ;;  %s32_s21 = int_to_ptr.vmem [resolvable:$true] %s31_s21 }
   0x8   :  { %34 = dma.hbm_to_vmem [thread:$0]  %s30_s19, 256, %s32_s21, [#allocation6]  }
   0x9   :  { %189 = dma.done.wait [#allocation3], 256  }
   0xa   :  { %190 = vsyncadd [#allocation3], 4294967040 }
   0xb   :  { %191 = dma.done.wait [#allocation6], 256  }
   0xc   :  { %192 = vsyncadd [#allocation6], 4294967040  ;;  %s199_s22 = smov [#allocation7]   ;;  %s62_s25 = sshll.u32 %s235_s2, 4  ;;  %v43_v0 = vld [vmem:[#allocation2] sm:$0xff]  ;;  %v45_v1 = vld [vmem:[#allocation5] sm:$0xff]  ;;  %s63_s25 = int_to_ptr.hbm [resolvable:$true] %s62_s25 }
   0xd   :  { %s60_s0 = sshll.u32 %s199_s22, 4  ;;  %v44_v2 = vld [vmem:[#allocation2 + $0x8] sm:$0xff]  ;;  %v47_v3 = vadd.f32 %v45_v1, %v43_v0  ;;  %v46_v4 = vld [vmem:[#allocation5 + $0x8] sm:$0xff]  ;;  %v51_v5 = vsub.f32 %v43_v0, %v45_v1  ;;  %s200_s1 = smov [#allocation8]   ;;  %s61_s0 = int_to_ptr.vmem [resolvable:$true] %s60_s0 }
   0xe   :  { %s71_s26 = sshll.u32 %s200_s1, 4  ;;  %s73_s29 = sshll.u32 %s236_s3, 4  ;;  %v48_v6 = vadd.f32 %v46_v4, %v44_v2  ;;  %v52_v7 = vsub.f32 %v44_v2, %v46_v4  ;;  %s72_s26 = int_to_ptr.vmem [resolvable:$true] %s71_s26  ;;  %s74_s29 = int_to_ptr.hbm [resolvable:$true] %s73_s29 }
   0xf   :  { %49 = vst [vmem:[#allocation7] sm:$0xff] %v47_v3 }
  0x10   :  { %50 = vst [vmem:[#allocation7 + $0x8] sm:$0xff] %v48_v6 }
  0x11   :  { %53 = vst [vmem:[#allocation8] sm:$0xff] %v51_v5  ;;  %65 = dma.vmem_to_hbm [thread:$0]  %s61_s0, 256, %s63_s25, [#allocation4]  }
  0x12   :  { %54 = vst [vmem:[#allocation8 + $0x8] sm:$0xff] %v52_v7 }
  0x13   :  { %76 = dma.vmem_to_hbm [thread:$0]  %s72_s26, 256, %s74_s29, [#allocation9]  }
  0x14   :  { %193 = dma.done.wait [#allocation4], 256  }
  0x15   :  { %194 = vsyncadd [#allocation4], 4294967040 }
  0x16   :  { %195 = dma.done.wait [#allocation9], 256  }
  0x17   :  { %196 = vsyncadd [#allocation9], 4294967040 }
  0x18   :  { %85 = vsyncpa [#allocation3], 1 }
  0x19   :  { %86 = vsyncpa [#allocation6], 1 }
  0x1a   :  { %87 = vsyncpa [#allocation4], 1 }
  0x1b   :  { %88 = vsyncpa [#allocation9], 1 }

</bundles_post_ra>
